<compile_context>
chip_gen: v6e
topology: v6e:2x2x1
jax: 0.10.0
libtpu: 0.0.40
codegen_flags: <defaults>
</compile_context>

<pallas_src>
import functools
import math

import jax
import jax.numpy as jnp
from jax import lax
from jax.experimental import pallas as pl
from jax.experimental.pallas import tpu as pltpu


# contract over the last dim of both operands == q @ k^T without materializing k^T
_NT_DIMS = (((1,), (1,)), ((), ()))


def encoder_layer_kernel(xq_ref, xkv_ref,
                         wqT_ref, wkT_ref, wvT_ref, woT_ref,
                         ln1_g_ref, ln1_b_ref,
                         w1T_ref, b1_ref, w2T_ref, b2_ref,
                         ln2_g_ref, ln2_b_ref,
                         out_ref, *, n_heads, eps):
    xq = xq_ref[0].astype(jnp.float32)            # (Tq, D) residual / LN path in f32
    Tq, D = xq.shape
    dh = D // n_heads

    xq_b = xq.astype(jnp.bfloat16)
    xkv_b = xkv_ref[0].astype(jnp.bfloat16)       # (T, D) keys/values source

    # ---- projections (weights pre-transposed in the wrapper: y = x @ W^T == x @ wT) ----
    inv_scale = 1.0 / math.sqrt(D)                # PyTorch Attention scale = sqrt(d_model)
    q = jnp.dot(xq_b, wqT_ref[...], preferred_element_type=jnp.float32) * inv_scale
    k = jnp.dot(xkv_b, wkT_ref[...], preferred_element_type=jnp.float32)
    v = jnp.dot(xkv_b, wvT_ref[...], preferred_element_type=jnp.float32)
    q_b = q.astype(jnp.bfloat16)
    k_b = k.astype(jnp.bfloat16)
    v_b = v.astype(jnp.bfloat16)

    # ---- per-head attention (causal=False, dropout = identity in eval) ----
    heads = []
    for h in range(n_heads):                      # static unroll over heads
        sl = slice(h * dh, (h + 1) * dh)
        s = lax.dot_general(q_b[:, sl], k_b[:, sl], _NT_DIMS,
                            preferred_element_type=jnp.float32)          # (Tq, T)
        s = s - jnp.max(s, axis=-1, keepdims=True)
        p = jnp.exp(s)
        p = p * pl.reciprocal(jnp.sum(p, axis=-1, keepdims=True), approx=True)
        heads.append(jnp.dot(p.astype(jnp.bfloat16), v_b[:, sl],
                             preferred_element_type=jnp.float32))         # (Tq, dh)
    ctx = jnp.concatenate(heads, axis=-1)                                 # (Tq, D)
    attn = jnp.dot(ctx.astype(jnp.bfloat16), woT_ref[...],
                   preferred_element_type=jnp.float32)

    def layernorm(t, gamma, beta):
        mean = jnp.mean(t, axis=-1, keepdims=True)
        # torch.std default: unbiased estimator (divide by D-1); eps added to std
        var = jnp.sum((t - mean) ** 2, axis=-1, keepdims=True) / (D - 1)
        return gamma * (t - mean) / (jnp.sqrt(var) + eps) + beta

    # residual + layernorm 1 (f32)
    y1 = layernorm(xq + attn, ln1_g_ref[...], ln1_b_ref[...])

    # ---- feed-forward ----
    h1 = jnp.dot(y1.astype(jnp.bfloat16), w1T_ref[...],
                 preferred_element_type=jnp.float32) + b1_ref[...]
    h1 = jnp.maximum(h1, 0.0)
    ff = jnp.dot(h1.astype(jnp.bfloat16), w2T_ref[...],
                 preferred_element_type=jnp.float32) + b2_ref[...]

    # residual + layernorm 2 (f32)
    y2 = layernorm(y1 + ff, ln2_g_ref[...], ln2_b_ref[...])
    out_ref[0] = y2.astype(out_ref.dtype)


def _pick_block_q(T):
    """Largest power-of-two tile (<=512, >=8) that divides T; else the full T."""
    for cand in (512, 256, 128, 64, 32, 16, 8):
        if T % cand == 0:
            return cand
    return T


def encoder_layer(x, params, n_heads, eps=1e-6):
    B, T, D = x.shape
    d_hidden = params["w1"].shape[0]
    assert D % n_heads == 0
    Tq = _pick_block_q(T)
    n_q = T // Tq

    bf16 = jnp.bfloat16
    # Pre-transpose weights once on the host (no in-kernel transposes) and store bf16
    # (MXU-native inputs; accumulation stays f32 inside the kernel).
    wqT = jnp.asarray(params["wq"], jnp.float32).T.astype(bf16)    # (D, D)
    wkT = jnp.asarray(params["wk"], jnp.float32).T.astype(bf16)
    wvT = jnp.asarray(params["wv"], jnp.float32).T.astype(bf16)
    woT = jnp.asarray(params["wo"], jnp.float32).T.astype(bf16)
    w1T = jnp.asarray(params["w1"], jnp.float32).T.astype(bf16)    # (D, d_hidden)
    w2T = jnp.asarray(params["w2"], jnp.float32).T.astype(bf16)    # (d_hidden, D)

    vec = lambda a: jnp.asarray(a, jnp.float32).reshape(1, -1)

    def bcast_spec(shape):
        # whole-array block, broadcast across both grid axes (fetched once, then reused)
        return pl.BlockSpec(shape, lambda b, qi: (0,) * len(shape))

    # explicit scoped-VMEM budget derived from the tile footprint, clamped to a value
    # that is legal on every generation (v7x physical VMEM is 64 MiB).
    f32b, b16b = 4, 2
    weight_bytes = (4 * D * D + 2 * D * d_hidden) * b16b + (6 * D + 2 * d_hidden) * f32b
    block_bytes = (2 * Tq * D + T * D) * f32b                      # x_q + out + x_kv blocks
    inter_bytes = (n_heads * Tq * T + 3 * T * D + 2 * Tq * d_hidden + 6 * Tq * D) * f32b
    vmem_limit = int(min(max(2 * weight_bytes + 2 * block_bytes + 2 * inter_bytes,
                             16 * 2 ** 20),
                         48 * 2 ** 20))

    kernel = functools.partial(encoder_layer_kernel, n_heads=n_heads, eps=eps)
    return pl.pallas_call(
        kernel,
        out_shape=jax.ShapeDtypeStruct((B, T, D), x.dtype),
        grid=(B, n_q),
        in_specs=[
            pl.BlockSpec((1, Tq, D), lambda b, qi: (b, qi, 0)),    # x : query/residual block
            pl.BlockSpec((1, T, D), lambda b, qi: (b, 0, 0)),      # x : full sequence for K/V
            bcast_spec((D, D)),            # wq^T   (bf16)
            bcast_spec((D, D)),            # wk^T
            bcast_spec((D, D)),            # wv^T
            bcast_spec((D, D)),            # wo^T
            bcast_spec((1, D)),            # ln1 gamma
            bcast_spec((1, D)),            # ln1 beta
            bcast_spec((D, d_hidden)),     # ff linear1 weight^T (bf16)
            bcast_spec((1, d_hidden)),     # ff linear1 bias
            bcast_spec((d_hidden, D)),     # ff linear2 weight^T (bf16)
            bcast_spec((1, D)),            # ff linear2 bias
            bcast_spec((1, D)),            # ln2 gamma
            bcast_spec((1, D)),            # ln2 beta
        ],
        out_specs=pl.BlockSpec((1, Tq, D), lambda b, qi: (b, qi, 0)),
        compiler_params=pltpu.CompilerParams(
            dimension_semantics=("parallel", "parallel"),
            vmem_limit_bytes=vmem_limit),
    )(x, x,
      wqT, wkT, wvT, woT,
      vec(params["ln1_g"]), vec(params["ln1_b"]),
      w1T, vec(params["b1"]),
      w2T, vec(params["b2"]),
      vec(params["ln2_g"]), vec(params["ln2_b"]))


def reference_encoder_layer(x, params, n_heads, eps=1e-6):
    """Pure-JAX f32 replica of the PyTorch forward (eval mode) for verification."""
    x = x.astype(jnp.float32)
    D = x.shape[-1]
    dh = D // n_heads

    def ln(v, g, b):
        mean = jnp.mean(v, axis=-1, keepdims=True)
        std = jnp.sqrt(jnp.sum((v - mean) ** 2, axis=-1, keepdims=True) / (D - 1))
        return g * (v - mean) / (std + eps) + b

    q = x @ params["wq"].T
    k = x @ params["wk"].T
    v = x @ params["wv"].T
    outs = []
    for h in range(n_heads):
        sl = slice(h * dh, (h + 1) * dh)
        s = jnp.einsum("btd,bsd->bts", q[..., sl], k[..., sl]) / math.sqrt(D)
        p = jax.nn.softmax(s, axis=-1)
        outs.append(jnp.einsum("bts,bsd->btd", p, v[..., sl]))
    attn = jnp.concatenate(outs, axis=-1) @ params["wo"].T
    y1 = ln(x + attn, params["ln1_g"], params["ln1_b"])
    ff = jnp.maximum(y1 @ params["w1"].T + params["b1"], 0.0) @ params["w2"].T + params["b2"]
    return ln(y1 + ff, params["ln2_g"], params["ln2_b"])


if __name__ == "__main__":
    B, T, d_model, d_hidden, n_heads = 2, 8, 32, 64, 4

    ks = jax.random.split(jax.random.PRNGKey(0), 9)
    params = {
        "wq": 0.1 * jax.random.normal(ks[0], (d_model, d_model), jnp.float32),
        "wk": 0.1 * jax.random.normal(ks[1], (d_model, d_model), jnp.float32),
        "wv": 0.1 * jax.random.normal(ks[2], (d_model, d_model), jnp.float32),
        "wo": 0.1 * jax.random.normal(ks[3], (d_model, d_model), jnp.float32),
        "ln1_g": jnp.ones((d_model,), jnp.float32),
        "ln1_b": jnp.zeros((d_model,), jnp.float32),
        "w1": 0.1 * jax.random.normal(ks[4], (d_hidden, d_model), jnp.float32),
        "b1": 0.01 * jax.random.normal(ks[5], (d_hidden,), jnp.float32),
        "w2": 0.1 * jax.random.normal(ks[6], (d_model, d_hidden), jnp.float32),
        "b2": 0.01 * jax.random.normal(ks[7], (d_model,), jnp.float32),
        "ln2_g": jnp.ones((d_model,), jnp.float32),
        "ln2_b": jnp.zeros((d_model,), jnp.float32),
    }
    x = jax.random.normal(ks[8], (B, T, d_model), jnp.float32)

    out = jax.block_until_ready(encoder_layer(x, params, n_heads))
    ref = reference_encoder_layer(x, params, n_heads)

    assert out.shape == (B, T, d_model)
    # bf16 MXU inputs (f32 accumulation) + approx softmax reciprocal -> loosened tolerance
    # vs the pure-f32 reference; LayerNorm/softmax stay f32 so there is no bias.
    assert jnp.allclose(out, ref, atol=5e-2, rtol=5e-2), "mismatch vs pure-JAX reference"

    print("KERNEL_OK")
</pallas_src>

<mosaic_0001>
module attributes {stable_mosaic.version = 11 : i64} {
  func.func @encoder_layer_kernel(%arg0: i32, %arg1: i32, %arg2: memref<1x8x32xf32, #tpu.memory_space<vmem>>, %arg3: memref<1x8x32xf32, #tpu.memory_space<vmem>>, %arg4: memref<32x32xbf16, #tpu.memory_space<vmem>>, %arg5: memref<32x32xbf16, #tpu.memory_space<vmem>>, %arg6: memref<32x32xbf16, #tpu.memory_space<vmem>>, %arg7: memref<32x32xbf16, #tpu.memory_space<vmem>>, %arg8: memref<1x32xf32, #tpu.memory_space<vmem>>, %arg9: memref<1x32xf32, #tpu.memory_space<vmem>>, %arg10: memref<32x64xbf16, #tpu.memory_space<vmem>>, %arg11: memref<1x64xf32, #tpu.memory_space<vmem>>, %arg12: memref<64x32xbf16, #tpu.memory_space<vmem>>, %arg13: memref<1x32xf32, #tpu.memory_space<vmem>>, %arg14: memref<1x32xf32, #tpu.memory_space<vmem>>, %arg15: memref<1x32xf32, #tpu.memory_space<vmem>>, %arg16: memref<1x8x32xf32, #tpu.memory_space<vmem>>) attributes {dimension_semantics = [#tpu.dimension_semantics<parallel>, #tpu.dimension_semantics<parallel>], iteration_bounds = array<i64: 2, 1>, scalar_prefetch = 0 : i64, scratch_operands = 0 : i64, tpu.core_type = #tpu.core_type<tc>, window_params = [{transform_indices = @transform_0, window_bounds = array<i64: 1, 8, 32>}, {transform_indices = @transform_1, window_bounds = array<i64: 1, 8, 32>}, {pipeline_mode = #tpu.pipeline_mode<synchronous>, transform_indices = @transform_2, window_bounds = array<i64: 32, 32>}, {pipeline_mode = #tpu.pipeline_mode<synchronous>, transform_indices = @transform_3, window_bounds = array<i64: 32, 32>}, {pipeline_mode = #tpu.pipeline_mode<synchronous>, transform_indices = @transform_4, window_bounds = array<i64: 32, 32>}, {pipeline_mode = #tpu.pipeline_mode<synchronous>, transform_indices = @transform_5, window_bounds = array<i64: 32, 32>}, {pipeline_mode = #tpu.pipeline_mode<synchronous>, transform_indices = @transform_6, window_bounds = array<i64: 1, 32>}, {pipeline_mode = #tpu.pipeline_mode<synchronous>, transform_indices = @transform_7, window_bounds = array<i64: 1, 32>}, {pipeline_mode = #tpu.pipeline_mode<synchronous>, transform_indices = @transform_8, window_bounds = array<i64: 32, 64>}, {pipeline_mode = #tpu.pipeline_mode<synchronous>, transform_indices = @transform_9, window_bounds = array<i64: 1, 64>}, {pipeline_mode = #tpu.pipeline_mode<synchronous>, transform_indices = @transform_10, window_bounds = array<i64: 64, 32>}, {pipeline_mode = #tpu.pipeline_mode<synchronous>, transform_indices = @transform_11, window_bounds = array<i64: 1, 32>}, {pipeline_mode = #tpu.pipeline_mode<synchronous>, transform_indices = @transform_12, window_bounds = array<i64: 1, 32>}, {pipeline_mode = #tpu.pipeline_mode<synchronous>, transform_indices = @transform_13, window_bounds = array<i64: 1, 32>}, {transform_indices = @transform_14, window_bounds = array<i64: 1, 8, 32>}]} {
    %c0 = arith.constant 0 : index
    %c0_0 = arith.constant 0 : index
    %c0_1 = arith.constant 0 : index
    %0 = vector.load %arg2[%c0, %c0_0, %c0_1] : memref<1x8x32xf32, #tpu.memory_space<vmem>>, vector<1x8x32xf32>
    %1 = vector.shape_cast %0 : vector<1x8x32xf32> to vector<8x32xf32>
    %2 = arith.truncf %1 : vector<8x32xf32> to vector<8x32xbf16>
    %c0_2 = arith.constant 0 : index
    %c0_3 = arith.constant 0 : index
    %c0_4 = arith.constant 0 : index
    %3 = vector.load %arg3[%c0_2, %c0_3, %c0_4] : memref<1x8x32xf32, #tpu.memory_space<vmem>>, vector<1x8x32xf32>
    %4 = vector.shape_cast %3 : vector<1x8x32xf32> to vector<8x32xf32>
    %5 = arith.truncf %4 : vector<8x32xf32> to vector<8x32xbf16>
    %c0_5 = arith.constant 0 : index
    %c0_6 = arith.constant 0 : index
    %6 = vector.load %arg4[%c0_5, %c0_6] : memref<32x32xbf16, #tpu.memory_space<vmem>>, vector<32x32xbf16>
    %cst = arith.constant dense<0.000000e+00> : vector<8x32xf32>
    %7 = tpu.matmul %2, %6, %cst {dimension_numbers = #tpu.dot_dimension_numbers<[1], [0], [0], [1], [0, 0, 1, 1], [], []>} : vector<8x32xbf16>, vector<32x32xbf16>, vector<8x32xf32> -> vector<8x32xf32>
    %cst_7 = arith.constant 0.176776692 : f32
    %8 = vector.broadcast %cst_7 : f32 to vector<8x32xf32>
    %9 = arith.mulf %7, %8 : vector<8x32xf32>
    %c0_8 = arith.constant 0 : index
    %c0_9 = arith.constant 0 : index
    %10 = vector.load %arg5[%c0_8, %c0_9] : memref<32x32xbf16, #tpu.memory_space<vmem>>, vector<32x32xbf16>
    %cst_10 = arith.constant dense<0.000000e+00> : vector<8x32xf32>
    %11 = tpu.matmul %5, %10, %cst_10 {dimension_numbers = #tpu.dot_dimension_numbers<[1], [0], [0], [1], [0, 0, 1, 1], [], []>} : vector<8x32xbf16>, vector<32x32xbf16>, vector<8x32xf32> -> vector<8x32xf32>
    %c0_11 = arith.constant 0 : index
    %c0_12 = arith.constant 0 : index
    %12 = vector.load %arg6[%c0_11, %c0_12] : memref<32x32xbf16, #tpu.memory_space<vmem>>, vector<32x32xbf16>
    %cst_13 = arith.constant dense<0.000000e+00> : vector<8x32xf32>
    %13 = tpu.matmul %5, %12, %cst_13 {dimension_numbers = #tpu.dot_dimension_numbers<[1], [0], [0], [1], [0, 0, 1, 1], [], []>} : vector<8x32xbf16>, vector<32x32xbf16>, vector<8x32xf32> -> vector<8x32xf32>
    %14 = arith.truncf %9 : vector<8x32xf32> to vector<8x32xbf16>
    %15 = arith.truncf %11 : vector<8x32xf32> to vector<8x32xbf16>
    %16 = arith.truncf %13 : vector<8x32xf32> to vector<8x32xbf16>
    %17 = vector.extract_strided_slice %14 {offsets = [0, 0], sizes = [8, 8], strides = [1, 1]} : vector<8x32xbf16> to vector<8x8xbf16>
    %18 = vector.extract_strided_slice %15 {offsets = [0, 0], sizes = [8, 8], strides = [1, 1]} : vector<8x32xbf16> to vector<8x8xbf16>
    %cst_14 = arith.constant dense<0.000000e+00> : vector<8x8xf32>
    %19 = tpu.matmul %17, %18, %cst_14 {dimension_numbers = #tpu.dot_dimension_numbers<[1], [1], [0], [0], [0, 0, 1, 0], [], []>} : vector<8x8xbf16>, vector<8x8xbf16>, vector<8x8xf32> -> vector<8x8xf32>
    %cst_15 = arith.constant dense<0xFF800000> : vector<8xf32>
    %20 = vector.multi_reduction <maximumf>, %19, %cst_15 [1] : vector<8x8xf32> to vector<8xf32>
    %21 = vector.shape_cast %20 : vector<8xf32> to vector<8x1xf32>
    %22 = vector.broadcast %21 : vector<8x1xf32> to vector<8x8xf32>
    %23 = arith.subf %19, %22 : vector<8x8xf32>
    %24 = math.exp %23 : vector<8x8xf32>
    %cst_16 = arith.constant dense<0.000000e+00> : vector<8xf32>
    %25 = vector.multi_reduction <add>, %24, %cst_16 [1] : vector<8x8xf32> to vector<8xf32>
    %26 = vector.shape_cast %25 : vector<8xf32> to vector<8x1xf32>
    %27 = tpu.reciprocal %26 {approx = true} : vector<8x1xf32> -> vector<8x1xf32>
    %28 = vector.broadcast %27 : vector<8x1xf32> to vector<8x8xf32>
    %29 = arith.mulf %24, %28 : vector<8x8xf32>
    %30 = arith.truncf %29 : vector<8x8xf32> to vector<8x8xbf16>
    %31 = vector.extract_strided_slice %16 {offsets = [0, 0], sizes = [8, 8], strides = [1, 1]} : vector<8x32xbf16> to vector<8x8xbf16>
    %cst_17 = arith.constant dense<0.000000e+00> : vector<8x8xf32>
    %32 = tpu.matmul %30, %31, %cst_17 {dimension_numbers = #tpu.dot_dimension_numbers<[1], [0], [0], [1], [0, 0, 1, 1], [], []>} : vector<8x8xbf16>, vector<8x8xbf16>, vector<8x8xf32> -> vector<8x8xf32>
    %33 = vector.extract_strided_slice %14 {offsets = [0, 8], sizes = [8, 8], strides = [1, 1]} : vector<8x32xbf16> to vector<8x8xbf16>
    %34 = vector.extract_strided_slice %15 {offsets = [0, 8], sizes = [8, 8], strides = [1, 1]} : vector<8x32xbf16> to vector<8x8xbf16>
    %cst_18 = arith.constant dense<0.000000e+00> : vector<8x8xf32>
    %35 = tpu.matmul %33, %34, %cst_18 {dimension_numbers = #tpu.dot_dimension_numbers<[1], [1], [0], [0], [0, 0, 1, 0], [], []>} : vector<8x8xbf16>, vector<8x8xbf16>, vector<8x8xf32> -> vector<8x8xf32>
    %cst_19 = arith.constant dense<0xFF800000> : vector<8xf32>
    %36 = vector.multi_reduction <maximumf>, %35, %cst_19 [1] : vector<8x8xf32> to vector<8xf32>
    %37 = vector.shape_cast %36 : vector<8xf32> to vector<8x1xf32>
    %38 = vector.broadcast %37 : vector<8x1xf32> to vector<8x8xf32>
    %39 = arith.subf %35, %38 : vector<8x8xf32>
    %40 = math.exp %39 : vector<8x8xf32>
    %cst_20 = arith.constant dense<0.000000e+00> : vector<8xf32>
    %41 = vector.multi_reduction <add>, %40, %cst_20 [1] : vector<8x8xf32> to vector<8xf32>
    %42 = vector.shape_cast %41 : vector<8xf32> to vector<8x1xf32>
    %43 = tpu.reciprocal %42 {approx = true} : vector<8x1xf32> -> vector<8x1xf32>
    %44 = vector.broadcast %43 : vector<8x1xf32> to vector<8x8xf32>
    %45 = arith.mulf %40, %44 : vector<8x8xf32>
    %46 = arith.truncf %45 : vector<8x8xf32> to vector<8x8xbf16>
    %47 = vector.extract_strided_slice %16 {offsets = [0, 8], sizes = [8, 8], strides = [1, 1]} : vector<8x32xbf16> to vector<8x8xbf16>
    %cst_21 = arith.constant dense<0.000000e+00> : vector<8x8xf32>
    %48 = tpu.matmul %46, %47, %cst_21 {dimension_numbers = #tpu.dot_dimension_numbers<[1], [0], [0], [1], [0, 0, 1, 1], [], []>} : vector<8x8xbf16>, vector<8x8xbf16>, vector<8x8xf32> -> vector<8x8xf32>
    %49 = vector.extract_strided_slice %14 {offsets = [0, 16], sizes = [8, 8], strides = [1, 1]} : vector<8x32xbf16> to vector<8x8xbf16>
    %50 = vector.extract_strided_slice %15 {offsets = [0, 16], sizes = [8, 8], strides = [1, 1]} : vector<8x32xbf16> to vector<8x8xbf16>
    %cst_22 = arith.constant dense<0.000000e+00> : vector<8x8xf32>
    %51 = tpu.matmul %49, %50, %cst_22 {dimension_numbers = #tpu.dot_dimension_numbers<[1], [1], [0], [0], [0, 0, 1, 0], [], []>} : vector<8x8xbf16>, vector<8x8xbf16>, vector<8x8xf32> -> vector<8x8xf32>
    %cst_23 = arith.constant dense<0xFF800000> : vector<8xf32>
    %52 = vector.multi_reduction <maximumf>, %51, %cst_23 [1] : vector<8x8xf32> to vector<8xf32>
    %53 = vector.shape_cast %52 : vector<8xf32> to vector<8x1xf32>
    %54 = vector.broadcast %53 : vector<8x1xf32> to vector<8x8xf32>
    %55 = arith.subf %51, %54 : vector<8x8xf32>
    %56 = math.exp %55 : vector<8x8xf32>
    %cst_24 = arith.constant dense<0.000000e+00> : vector<8xf32>
    %57 = vector.multi_reduction <add>, %56, %cst_24 [1] : vector<8x8xf32> to vector<8xf32>
    %58 = vector.shape_cast %57 : vector<8xf32> to vector<8x1xf32>
    %59 = tpu.reciprocal %58 {approx = true} : vector<8x1xf32> -> vector<8x1xf32>
    %60 = vector.broadcast %59 : vector<8x1xf32> to vector<8x8xf32>
    %61 = arith.mulf %56, %60 : vector<8x8xf32>
    %62 = arith.truncf %61 : vector<8x8xf32> to vector<8x8xbf16>
    %63 = vector.extract_strided_slice %16 {offsets = [0, 16], sizes = [8, 8], strides = [1, 1]} : vector<8x32xbf16> to vector<8x8xbf16>
    %cst_25 = arith.constant dense<0.000000e+00> : vector<8x8xf32>
    %64 = tpu.matmul %62, %63, %cst_25 {dimension_numbers = #tpu.dot_dimension_numbers<[1], [0], [0], [1], [0, 0, 1, 1], [], []>} : vector<8x8xbf16>, vector<8x8xbf16>, vector<8x8xf32> -> vector<8x8xf32>
    %65 = vector.extract_strided_slice %14 {offsets = [0, 24], sizes = [8, 8], strides = [1, 1]} : vector<8x32xbf16> to vector<8x8xbf16>
    %66 = vector.extract_strided_slice %15 {offsets = [0, 24], sizes = [8, 8], strides = [1, 1]} : vector<8x32xbf16> to vector<8x8xbf16>
    %cst_26 = arith.constant dense<0.000000e+00> : vector<8x8xf32>
    %67 = tpu.matmul %65, %66, %cst_26 {dimension_numbers = #tpu.dot_dimension_numbers<[1], [1], [0], [0], [0, 0, 1, 0], [], []>} : vector<8x8xbf16>, vector<8x8xbf16>, vector<8x8xf32> -> vector<8x8xf32>
    %cst_27 = arith.constant dense<0xFF800000> : vector<8xf32>
    %68 = vector.multi_reduction <maximumf>, %67, %cst_27 [1] : vector<8x8xf32> to vector<8xf32>
    %69 = vector.shape_cast %68 : vector<8xf32> to vector<8x1xf32>
    %70 = vector.broadcast %69 : vector<8x1xf32> to vector<8x8xf32>
    %71 = arith.subf %67, %70 : vector<8x8xf32>
    %72 = math.exp %71 : vector<8x8xf32>
    %cst_28 = arith.constant dense<0.000000e+00> : vector<8xf32>
    %73 = vector.multi_reduction <add>, %72, %cst_28 [1] : vector<8x8xf32> to vector<8xf32>
    %74 = vector.shape_cast %73 : vector<8xf32> to vector<8x1xf32>
    %75 = tpu.reciprocal %74 {approx = true} : vector<8x1xf32> -> vector<8x1xf32>
    %76 = vector.broadcast %75 : vector<8x1xf32> to vector<8x8xf32>
    %77 = arith.mulf %72, %76 : vector<8x8xf32>
    %78 = arith.truncf %77 : vector<8x8xf32> to vector<8x8xbf16>
    %79 = vector.extract_strided_slice %16 {offsets = [0, 24], sizes = [8, 8], strides = [1, 1]} : vector<8x32xbf16> to vector<8x8xbf16>
    %cst_29 = arith.constant dense<0.000000e+00> : vector<8x8xf32>
    %80 = tpu.matmul %78, %79, %cst_29 {dimension_numbers = #tpu.dot_dimension_numbers<[1], [0], [0], [1], [0, 0, 1, 1], [], []>} : vector<8x8xbf16>, vector<8x8xbf16>, vector<8x8xf32> -> vector<8x8xf32>
    %81 = tpu.concatenate %32, %48, %64, %80 in 1 : vector<8x8xf32>, vector<8x8xf32>, vector<8x8xf32>, vector<8x8xf32> -> vector<8x32xf32>
    %82 = arith.truncf %81 : vector<8x32xf32> to vector<8x32xbf16>
    %c0_30 = arith.constant 0 : index
    %c0_31 = arith.constant 0 : index
    %83 = vector.load %arg7[%c0_30, %c0_31] : memref<32x32xbf16, #tpu.memory_space<vmem>>, vector<32x32xbf16>
    %cst_32 = arith.constant dense<0.000000e+00> : vector<8x32xf32>
    %84 = tpu.matmul %82, %83, %cst_32 {dimension_numbers = #tpu.dot_dimension_numbers<[1], [0], [0], [1], [0, 0, 1, 1], [], []>} : vector<8x32xbf16>, vector<32x32xbf16>, vector<8x32xf32> -> vector<8x32xf32>
    %85 = arith.addf %1, %84 : vector<8x32xf32>
    %c0_33 = arith.constant 0 : index
    %c0_34 = arith.constant 0 : index
    %86 = vector.load %arg8[%c0_33, %c0_34] : memref<1x32xf32, #tpu.memory_space<vmem>>, vector<1x32xf32>
    %c0_35 = arith.constant 0 : index
    %c0_36 = arith.constant 0 : index
    %87 = vector.load %arg9[%c0_35, %c0_36] : memref<1x32xf32, #tpu.memory_space<vmem>>, vector<1x32xf32>
    %cst_37 = arith.constant dense<0.000000e+00> : vector<8xf32>
    %88 = vector.multi_reduction <add>, %85, %cst_37 [1] : vector<8x32xf32> to vector<8xf32>
    %89 = vector.shape_cast %88 : vector<8xf32> to vector<8x1xf32>
    %cst_38 = arith.constant 3.200000e+01 : f32
    %90 = vector.broadcast %cst_38 : f32 to vector<8x1xf32>
    %91 = arith.divf %89, %90 : vector<8x1xf32>
    %92 = vector.broadcast %91 : vector<8x1xf32> to vector<8x32xf32>
    %93 = arith.subf %85, %92 : vector<8x32xf32>
    %94 = arith.mulf %93, %93 : vector<8x32xf32>
    %cst_39 = arith.constant dense<0.000000e+00> : vector<8xf32>
    %95 = vector.multi_reduction <add>, %94, %cst_39 [1] : vector<8x32xf32> to vector<8xf32>
    %96 = vector.shape_cast %95 : vector<8xf32> to vector<8x1xf32>
    %cst_40 = arith.constant 3.100000e+01 : f32
    %97 = vector.broadcast %cst_40 : f32 to vector<8x1xf32>
    %98 = arith.divf %96, %97 : vector<8x1xf32>
    %99 = vector.broadcast %91 : vector<8x1xf32> to vector<8x32xf32>
    %100 = arith.subf %85, %99 : vector<8x32xf32>
    %101 = vector.broadcast %86 : vector<1x32xf32> to vector<8x32xf32>
    %102 = arith.mulf %101, %100 : vector<8x32xf32>
    %103 = math.sqrt %98 : vector<8x1xf32>
    %cst_41 = arith.constant 9.99999997E-7 : f32
    %104 = vector.broadcast %cst_41 : f32 to vector<8x1xf32>
    %105 = arith.addf %103, %104 : vector<8x1xf32>
    %106 = vector.broadcast %105 : vector<8x1xf32> to vector<8x32xf32>
    %107 = arith.divf %102, %106 : vector<8x32xf32>
    %108 = vector.broadcast %87 : vector<1x32xf32> to vector<8x32xf32>
    %109 = arith.addf %107, %108 : vector<8x32xf32>
    %110 = arith.truncf %109 : vector<8x32xf32> to vector<8x32xbf16>
    %c0_42 = arith.constant 0 : index
    %c0_43 = arith.constant 0 : index
    %111 = vector.load %arg10[%c0_42, %c0_43] : memref<32x64xbf16, #tpu.memory_space<vmem>>, vector<32x64xbf16>
    %cst_44 = arith.constant dense<0.000000e+00> : vector<8x64xf32>
    %112 = tpu.matmul %110, %111, %cst_44 {dimension_numbers = #tpu.dot_dimension_numbers<[1], [0], [0], [1], [0, 0, 1, 1], [], []>} : vector<8x32xbf16>, vector<32x64xbf16>, vector<8x64xf32> -> vector<8x64xf32>
    %c0_45 = arith.constant 0 : index
    %c0_46 = arith.constant 0 : index
    %113 = vector.load %arg11[%c0_45, %c0_46] : memref<1x64xf32, #tpu.memory_space<vmem>>, vector<1x64xf32>
    %114 = vector.broadcast %113 : vector<1x64xf32> to vector<8x64xf32>
    %115 = arith.addf %112, %114 : vector<8x64xf32>
    %cst_47 = arith.constant 0.000000e+00 : f32
    %116 = vector.broadcast %cst_47 : f32 to vector<8x64xf32>
    %117 = arith.maximumf %115, %116 : vector<8x64xf32>
    %118 = arith.truncf %117 : vector<8x64xf32> to vector<8x64xbf16>
    %c0_48 = arith.constant 0 : index
    %c0_49 = arith.constant 0 : index
    %119 = vector.load %arg12[%c0_48, %c0_49] : memref<64x32xbf16, #tpu.memory_space<vmem>>, vector<64x32xbf16>
    %cst_50 = arith.constant dense<0.000000e+00> : vector<8x32xf32>
    %120 = tpu.matmul %118, %119, %cst_50 {dimension_numbers = #tpu.dot_dimension_numbers<[1], [0], [0], [1], [0, 0, 1, 1], [], []>} : vector<8x64xbf16>, vector<64x32xbf16>, vector<8x32xf32> -> vector<8x32xf32>
    %c0_51 = arith.constant 0 : index
    %c0_52 = arith.constant 0 : index
    %121 = vector.load %arg13[%c0_51, %c0_52] : memref<1x32xf32, #tpu.memory_space<vmem>>, vector<1x32xf32>
    %122 = vector.broadcast %121 : vector<1x32xf32> to vector<8x32xf32>
    %123 = arith.addf %120, %122 : vector<8x32xf32>
    %124 = arith.addf %109, %123 : vector<8x32xf32>
    %c0_53 = arith.constant 0 : index
    %c0_54 = arith.constant 0 : index
    %125 = vector.load %arg14[%c0_53, %c0_54] : memref<1x32xf32, #tpu.memory_space<vmem>>, vector<1x32xf32>
    %c0_55 = arith.constant 0 : index
    %c0_56 = arith.constant 0 : index
    %126 = vector.load %arg15[%c0_55, %c0_56] : memref<1x32xf32, #tpu.memory_space<vmem>>, vector<1x32xf32>
    %cst_57 = arith.constant dense<0.000000e+00> : vector<8xf32>
    %127 = vector.multi_reduction <add>, %124, %cst_57 [1] : vector<8x32xf32> to vector<8xf32>
    %128 = vector.shape_cast %127 : vector<8xf32> to vector<8x1xf32>
    %cst_58 = arith.constant 3.200000e+01 : f32
    %129 = vector.broadcast %cst_58 : f32 to vector<8x1xf32>
    %130 = arith.divf %128, %129 : vector<8x1xf32>
    %131 = vector.broadcast %130 : vector<8x1xf32> to vector<8x32xf32>
    %132 = arith.subf %124, %131 : vector<8x32xf32>
    %133 = arith.mulf %132, %132 : vector<8x32xf32>
    %cst_59 = arith.constant dense<0.000000e+00> : vector<8xf32>
    %134 = vector.multi_reduction <add>, %133, %cst_59 [1] : vector<8x32xf32> to vector<8xf32>
    %135 = vector.shape_cast %134 : vector<8xf32> to vector<8x1xf32>
    %cst_60 = arith.constant 3.100000e+01 : f32
    %136 = vector.broadcast %cst_60 : f32 to vector<8x1xf32>
    %137 = arith.divf %135, %136 : vector<8x1xf32>
    %138 = vector.broadcast %130 : vector<8x1xf32> to vector<8x32xf32>
    %139 = arith.subf %124, %138 : vector<8x32xf32>
    %140 = vector.broadcast %125 : vector<1x32xf32> to vector<8x32xf32>
    %141 = arith.mulf %140, %139 : vector<8x32xf32>
    %142 = math.sqrt %137 : vector<8x1xf32>
    %cst_61 = arith.constant 9.99999997E-7 : f32
    %143 = vector.broadcast %cst_61 : f32 to vector<8x1xf32>
    %144 = arith.addf %142, %143 : vector<8x1xf32>
    %145 = vector.broadcast %144 : vector<8x1xf32> to vector<8x32xf32>
    %146 = arith.divf %141, %145 : vector<8x32xf32>
    %147 = vector.broadcast %126 : vector<1x32xf32> to vector<8x32xf32>
    %148 = arith.addf %146, %147 : vector<8x32xf32>
    %c0_62 = arith.constant 0 : index
    %c0_63 = arith.constant 0 : index
    %c0_64 = arith.constant 0 : index
    %149 = vector.load %arg16[%c0_62, %c0_63, %c0_64] : memref<1x8x32xf32, #tpu.memory_space<vmem>>, vector<1x8x32xf32>
    %150 = vector.shape_cast %149 : vector<1x8x32xf32> to vector<8x32xf32>
    %151 = vector.shape_cast %148 : vector<8x32xf32> to vector<1x8x32xf32>
    tpu.vector_store %arg16[%c0_62, %c0_63, %c0_64], %151 {strides = array<i32>} : memref<1x8x32xf32, #tpu.memory_space<vmem>>, vector<1x8x32xf32>,
    return
  }
  func.func @transform_0(%arg0: i32, %arg1: i32) -> (i32, i32, i32) {
    %c0_i32 = arith.constant 0 : i32
    %c0_i32_0 = arith.constant 0 : i32
    return %arg0, %arg1, %c0_i32 : i32, i32, i32
  }
  func.func @transform_1(%arg0: i32, %arg1: i32) -> (i32, i32, i32) {
    %c0_i32 = arith.constant 0 : i32
    %c0_i32_0 = arith.constant 0 : i32
    %c0_i32_1 = arith.constant 0 : i32
    return %arg0, %c0_i32, %c0_i32_0 : i32, i32, i32
  }
  func.func @transform_2(%arg0: i32, %arg1: i32) -> (i32, i32) {
    %c0_i32 = arith.constant 0 : i32
    %c0_i32_0 = arith.constant 0 : i32
    %c0_i32_1 = arith.constant 0 : i32
    return %c0_i32, %c0_i32_0 : i32, i32
  }
  func.func @transform_3(%arg0: i32, %arg1: i32) -> (i32, i32) {
    %c0_i32 = arith.constant 0 : i32
    %c0_i32_0 = arith.constant 0 : i32
    %c0_i32_1 = arith.constant 0 : i32
    return %c0_i32, %c0_i32_0 : i32, i32
  }
  func.func @transform_4(%arg0: i32, %arg1: i32) -> (i32, i32) {
    %c0_i32 = arith.constant 0 : i32
    %c0_i32_0 = arith.constant 0 : i32
    %c0_i32_1 = arith.constant 0 : i32
    return %c0_i32, %c0_i32_0 : i32, i32
  }
  func.func @transform_5(%arg0: i32, %arg1: i32) -> (i32, i32) {
    %c0_i32 = arith.constant 0 : i32
    %c0_i32_0 = arith.constant 0 : i32
    %c0_i32_1 = arith.constant 0 : i32
    return %c0_i32, %c0_i32_0 : i32, i32
  }
  func.func @transform_6(%arg0: i32, %arg1: i32) -> (i32, i32) {
    %c0_i32 = arith.constant 0 : i32
    %c0_i32_0 = arith.constant 0 : i32
    %c0_i32_1 = arith.constant 0 : i32
    return %c0_i32, %c0_i32_0 : i32, i32
  }
  func.func @transform_7(%arg0: i32, %arg1: i32) -> (i32, i32) {
    %c0_i32 = arith.constant 0 : i32
    %c0_i32_0 = arith.constant 0 : i32
    %c0_i32_1 = arith.constant 0 : i32
    return %c0_i32, %c0_i32_0 : i32, i32
  }
  func.func @transform_8(%arg0: i32, %arg1: i32) -> (i32, i32) {
    %c0_i32 = arith.constant 0 : i32
    %c0_i32_0 = arith.constant 0 : i32
    %c0_i32_1 = arith.constant 0 : i32
    return %c0_i32, %c0_i32_0 : i32, i32
  }
  func.func @transform_9(%arg0: i32, %arg1: i32) -> (i32, i32) {
    %c0_i32 = arith.constant 0 : i32
    %c0_i32_0 = arith.constant 0 : i32
    %c0_i32_1 = arith.constant 0 : i32
    return %c0_i32, %c0_i32_0 : i32, i32
  }
  func.func @transform_10(%arg0: i32, %arg1: i32) -> (i32, i32) {
    %c0_i32 = arith.constant 0 : i32
    %c0_i32_0 = arith.constant 0 : i32
    %c0_i32_1 = arith.constant 0 : i32
    return %c0_i32, %c0_i32_0 : i32, i32
  }
  func.func @transform_11(%arg0: i32, %arg1: i32) -> (i32, i32) {
    %c0_i32 = arith.constant 0 : i32
    %c0_i32_0 = arith.constant 0 : i32
    %c0_i32_1 = arith.constant 0 : i32
    return %c0_i32, %c0_i32_0 : i32, i32
  }
  func.func @transform_12(%arg0: i32, %arg1: i32) -> (i32, i32) {
    %c0_i32 = arith.constant 0 : i32
    %c0_i32_0 = arith.constant 0 : i32
    %c0_i32_1 = arith.constant 0 : i32
    return %c0_i32, %c0_i32_0 : i32, i32
  }
  func.func @transform_13(%arg0: i32, %arg1: i32) -> (i32, i32) {
    %c0_i32 = arith.constant 0 : i32
    %c0_i32_0 = arith.constant 0 : i32
    %c0_i32_1 = arith.constant 0 : i32
    return %c0_i32, %c0_i32_0 : i32, i32
  }
  func.func @transform_14(%arg0: i32, %arg1: i32) -> (i32, i32, i32) {
    %c0_i32 = arith.constant 0 : i32
    %c0_i32_0 = arith.constant 0 : i32
    return %arg0, %arg1, %c0_i32 : i32, i32, i32
  }
}

</mosaic_0001>

<bundles_post_ra>
// kernel: tpu_custom_call.1
= control target key start
LH: loop header
LB: loop body
LE: loop exit
PB: predicated region body
PF: predicated region fallthrough
CT: control target
= control target key end

     0   :  { %s2627_s0 = inlined_call_operand.vmem [shape: f32[2,8,32], index: 0, kind: input, shape index: {}]   ;;  %s2628_s1 = inlined_call_operand.vmem [shape: f32[2,8,32], index: 1, kind: input, shape index: {}]   ;;  %s2629_s2 = inlined_call_operand.vmem [shape: bf16[32,32], index: 2, kind: input, shape index: {}]   ;;  %s2630_s3 = inlined_call_operand.hbm [shape: bf16[32,32], index: 3, kind: input, shape index: {}]   ;;  %s2631_s4 = inlined_call_operand.hbm [shape: bf16[32,32], index: 4, kind: input, shape index: {}]   ;;  %s2632_s5 = inlined_call_operand.hbm [shape: bf16[32,32], index: 5, kind: input, shape index: {}]   ;;  %s2633_s6 = inlined_call_operand.vmem [shape: f32[1,32], index: 6, kind: input, shape index: {}]   ;;  %s2634_s7 = inlined_call_operand.vmem [shape: f32[1,32], index: 7, kind: input, shape index: {}]   ;;  %s2635_s8 = inlined_call_operand.hbm [shape: bf16[32,64], index: 8, kind: input, shape index: {}]   ;;  %s2636_s9 = inlined_call_operand.hbm [shape: f32[1,64], index: 9, kind: input, shape index: {}]   ;;  %s2637_s10 = inlined_call_operand.vmem [shape: bf16[64,32], index: 10, kind: input, shape index: {}]   ;;  %s2638_s11 = inlined_call_operand.vmem [shape: f32[1,32], index: 11, kind: input, shape index: {}]   ;;  %s2639_s12 = inlined_call_operand.vmem [shape: f32[1,32], index: 12, kind: input, shape index: {}]   ;;  %s2640_s13 = inlined_call_operand.vmem [shape: f32[1,32], index: 13, kind: input, shape index: {}]   ;;  %s2641_s14 = inlined_call_operand.hbm [shape: f32[2,8,32], index: 14, kind: output, shape index: {}]  }
   0x1   :  { %2650 = sst [smem:[#allocation23_spill]] %s2631_s4 }
   0x2   :  { %2651 = sst [smem:[#allocation24_spill]] %s2641_s14 }
   0x3   :  { %19 = vsyncpa [#allocation3], 0 }
   0x4   :  { %20 = vsyncpa [#allocation6], 0 }
   0x5   :  { %21 = vsyncpa [#allocation9], 0 }
   0x6   :  { %22 = vsyncpa [#allocation4], 0 }
   0x7   :  { %24 = vsyncpa [#allocation4 + $0x1], 0  ;;  %s2310_s29 = smov 0   ;;  %s2312_s30 = smov 0  }
   0x8   :  { %s2314_s15 = smov 0   ;;  %s2316_s16 = smov 0  }
   0x9   :  { %s2318_s17 = smov 0   ;;  %s2320_s18 = smov 0  }
   0xa LB: > { %2652 = sst [smem:[#allocation16_spill]] %s2197_s29  ;;  %s1653_s19 = sadd.s32 4294967295, %s2217_s18   ;;  %s2217_s18 = sphi %s2320_s18, %s30_s18   ;;  %s2213_s17 = sphi %s2318_s17, %s2675_s17   ;;  %s2209_s16 = sphi %s2316_s16, %s2678_s16   ;;  %s2205_s15 = sphi %s2314_s15, %s2673_s15   ;;  %s2201_s30 = sphi %s2312_s30, %s2677_s30   ;;  %s2197_s29 = sphi %s2310_s29, %s2676_s29  }
   0xb   : > { %2653 = sst [smem:[#allocation17_spill]] %s2205_s15  ;;  %s1654_s20 = sadd.s32 4294967294, %s2217_s18  }
   0xc   : > { %2654 = sst [smem:[#allocation18_spill]] %s2213_s17  ;;  %s42_s21 = sadd.s32 1, %s2213_s17 }
   0xd   : > { %2655 = sst [smem:[#allocation19_spill]] %s2217_s18  ;;  %s357_s22 = sadd.s32 1, %s2205_s15 }
   0xe   : > { %p44_p0 = scmp.ge.s32.totalorder %s42_s21, 2  ;;  %p367_p1 = scmp.ne.s32.totalorder %s2205_s15, %s2201_s30 }
   0xf   : > { %p368_p2 = scmp.eq.s32.totalorder %s1653_s19, 1  ;;  %p373_p3 = scmp.ne.s32.totalorder %s2201_s30, %s2197_s29 }
  0x10   : > { %s2680_s21 = smov (%p44_p0, %s42_s21), 0  ;;  %p374_p5 = scmp.eq.s32.totalorder %s1654_s20, 1 }
  0x11   : > { %2656 = sst [smem:[#allocation20_spill]] %s2680_s21  ;;  %p2350_p4 = por %p368_p2, %p367_p1 }
  0x12   : > { %s352_s24 = ssub.s32 %s2213_s17, %s2680_s21  ;;  %p1655_p6 = scmp.ge.s32.totalorder %s2217_s18, 1 }
  0x13   : > { %p355_p7 = scmp.eq.s32.totalorder %s352_s24, 0  ;;  %p2357_p8 = por %p374_p5, %p373_p3 }
  0x14   : > { %p381_p9 = scmp.lt.s32.totalorder %s2217_s18, 3  ;;  %p2369_p11 = scmp.eq.s32.totalorder %s1653_s19, 0 }
  0x15   : > { %s2658_s25 = scalar_select %p2357_p8, 1, 0 }
  0x16   : > { %s2363_s26 = scalar_select %p355_p7, %s2205_s15, %s357_s22  }
  0x17   : > { %2659 = sst [smem:[#allocation21_spill]] %s2658_s25  ;;  %p2365_p10 = pnand %p1655_p6, %p381_p9 }
  0x18   : > { %2660 = sst [smem:[#allocation22_spill]] %s2363_s26  ;;  %s2219_s20 = smov [#allocation5]  }
  0x19   : > { %p1867_p12 = pneg %p2365_p10  ;;  %s409_s24 = sshll.u32 %s2219_s20, 4  ;;  %s410_s24 = int_to_ptr.vmem [resolvable:$true] %s409_s24 }
  0x1a   : > { %s2220_s22 = smov [#allocation8]   ;;  %s2010_s26 = scalar_lea.vmem %s410_s24, 256 }
  0x1b   : > { %p2377_p13 = pnand %p2369_p11, %p1867_p12  ;;  %s441_s17 = sshll.u32 %s2220_s22, 4  ;;  %s442_s17 = int_to_ptr.vmem [resolvable:$true] %s441_s17 }
  0x1c   : > { %p2011_p1 = scmp.ne.s32.totalorder %s410_s24, %s2010_s26  ;;  %p2018_p5 = scmp.lt.s32.totalorder %s410_s24, %s410_s24 }
  0x1d   : > { %p2383_p0 = pneg %p2377_p13  ;;  %p2019_p6 = scmp.lt.s32.totalorder %s2010_s26, %s2010_s26 }
  0x1f   : > { %p2013_p2 = pnand %p2011_p1, %p2383_p0  ;;  %p2020_p7 = por %p2019_p6, %p2018_p5 }
  0x21   : > { %p2014_p3 = pneg %p2013_p2 }
  0x23   : > { %p2021_p9 = pnand %p2020_p7, %p2014_p3 }
  0x25   : > { %2024 = shalt.err (!%p2021_p9)
}
  0x26   : > { %s2221_s20 = smov 64   ;;  %s2222_s22 = smov 4  }
  0x27   : > { %s2665_s4 = sld [smem:[#allocation23_spill]]  ;;  %s2036_s29 = scalar_lea.vmem %s442_s17, 256 }
  0x28   : > { %p2037_p12 = scmp.ne.s32.totalorder %s442_s17, %s2036_s29  ;;  %p2044_p5 = scmp.lt.s32.totalorder %s442_s17, %s442_s17 }
  0x29   : > { %p2045_p3 = scmp.lt.s32.totalorder %s2036_s29, %s2036_s29 }
  0x2a   : > { %p2039_p1 = pnand %p2037_p12, %p2383_p0 }
  0x2b   : > { %p2046_p6 = por %p2045_p3, %p2044_p5 }
  0x2c   : > { %p2040_p2 = pneg %p2039_p1 }
  0x2d   : > { %1873 = dma.hbm_to_vmem [thread:$0]  (!%p2377_p13), %s2665_s4, 256, %s410_s24, [#allocation6], %s2221_s20, %s2221_s20, %s2222_s22  }
  0x2e   : > { %p2047_p7 = pnand %p2046_p6, %p2040_p2 }
  0x30   : > { %2050 = shalt.err (!%p2047_p7)
}
  0x31   : > { %1879 = dma.hbm_to_vmem [thread:$0]  (!%p2377_p13), %s2635_s8, 256, %s442_s17, [#allocation9], %s2221_s20, %s2221_s20, %s2222_s22  }
  0x32   : > { %s2223_s15 = smov [#allocation2]   ;;  %s2224_s24 = smov [#allocation7]  }
  0x33   : > { %s396_s25 = sshll.u32 %s2223_s15, 4  ;;  %s422_s4 = sshll.u32 %s2224_s24, 4  ;;  %s397_s25 = int_to_ptr.vmem [resolvable:$true] %s396_s25  ;;  %s423_s4 = int_to_ptr.vmem [resolvable:$true] %s422_s4 }
  0x34   : > { %s2062_s14 = scalar_lea.vmem %s397_s25, 256  ;;  %p2070_p2 = scmp.lt.s32.totalorder %s397_s25, %s397_s25 }
  0x35   : > { %p2063_p9 = scmp.ne.s32.totalorder %s397_s25, %s2062_s14  ;;  %p2071_p5 = scmp.lt.s32.totalorder %s2062_s14, %s2062_s14 }
  0x37   : > { %p2065_p12 = pnand %p2063_p9, %p2383_p0  ;;  %p2072_p3 = por %p2071_p5, %p2070_p2 }
  0x39   : > { %p2066_p1 = pneg %p2065_p12 }
  0x3b   : > { %p2073_p6 = pnand %p2072_p3, %p2066_p1 }
  0x3d   : > { %2076 = shalt.err (!%p2073_p6)
}
  0x3e   : > { %1870 = dma.hbm_to_vmem [thread:$0]  (!%p2377_p13), %s2630_s3, 256, %s397_s25, [#allocation3], %s2221_s20, %s2221_s20, %s2222_s22  }
  0x3f   : > { %s2088_s18 = scalar_lea.vmem %s423_s4, 256  ;;  %p2096_p8 = scmp.lt.s32.totalorder %s423_s4, %s423_s4 }
  0x40   : > { %p2089_p7 = scmp.ne.s32.totalorder %s423_s4, %s2088_s18  ;;  %p2097_p2 = scmp.lt.s32.totalorder %s2088_s18, %s2088_s18 }
  0x42   : > { %p2091_p9 = pnand %p2089_p7, %p2383_p0  ;;  %p2098_p1 = por %p2097_p2, %p2096_p8 }
  0x44   : > { %p2092_p12 = pneg %p2091_p9 }
  0x46   : > { %p2099_p5 = pnand %p2098_p1, %p2092_p12 }
  0x48   : > { %2102 = shalt.err (!%p2099_p5)
}
  0x49   : > { %1876 = dma.hbm_to_vmem [thread:$0]  (!%p2377_p13), %s2632_s5, 256, %s423_s4, [#allocation6], %s2221_s20, %s2221_s20, %s2222_s22  }
  0x4a   : > { %s2225_s15 = smov [#allocation10]  }
  0x4b   : > { %s455_s25 = sshll.u32 %s2225_s15, 4  ;;  %s456_s25 = int_to_ptr.vmem [resolvable:$true] %s455_s25 }
  0x4c   : > { %s2114_s24 = scalar_lea.vmem %s456_s25, 16  ;;  %s2121_s29 = scalar_lea.vmem %s456_s25, 32 }
  0x4d   : > { %p2115_p3 = scmp.ne.s32.totalorder %s456_s25, %s2114_s24  ;;  %p2122_p7 = scmp.lt.s32.totalorder %s456_s25, %s456_s25 }
  0x4e   : > { %p2123_p9 = scmp.lt.s32.totalorder %s2121_s29, %s2114_s24 }
  0x4f   : > { %p2117_p6 = pnand %p2115_p3, %p2383_p0 }
  0x50   : > { %p2124_p12 = por %p2123_p9, %p2122_p7 }
  0x51   : > { %p2118_p8 = pneg %p2117_p6 }
  0x53   : > { %p2125_p2 = pnand %p2124_p12, %p2118_p8 }
  0x55   : > { %2128 = shalt.err (!%p2125_p2)
}
  0x56   : > { %1882 = dma.hbm_to_vmem [thread:$0]  (!%p2377_p13), %s2636_s9, 16, %s456_s25, [#allocation9]  }
  0x57   : > { %497 = sbr.rel (%p2365_p10) target bundleno = 2513 (0x9d1), region = 76 }
  0x5c   : > { %2180 = dma.done.wait (%p2369_p11), [#allocation3], 256  }
  0x5d   : > { %2182 = vsyncadd (%p2369_p11), [#allocation3], 4294967040 }
  0x5e   : > { %2184 = dma.done.wait (%p2369_p11), [#allocation6], 512  }
  0x5f   : > { %2186 = vsyncadd (%p2369_p11), [#allocation6], 4294966784 }
  0x60   : > { %2188 = dma.done.wait (%p2369_p11), [#allocation9], 272  }
  0x61   : > { %2190 = vsyncadd (%p2369_p11), [#allocation9], 4294967024  ;;  %p565_p10 = scmp.lt.s32.totalorder %s2209_s16, 1  ;;  %v2226_v0 = vmov 0.0   ;;  %vm2227_vm0 = vmmov 0   ;;  %v1961_v1 = vld [vmem:[%s2629_s2 + $0x8] sm:$0xff]  }
  0x62   : > { %1745 = vmatprep.subr.bf16.mxu0 %v2226_v0  ;;  %1753 = vmatprep.subr.bf16.mxu1 %v2226_v0  ;;  %v1962_v2 = vld [vmem:[#allocation2 + $0x8] sm:$0xff]   ;;  %v1963_v3 = vld [vmem:[%s2629_s2] sm:$0xff]   ;;  %vm597_vm1 = vcmask 261120   ;;  %vm760_vm2 = vcmask 64512   ;;  %s2228_s29 = smov 112   ;;  %s2229_s17 = smov 120  }
  0x63   : > { %1749 = vmatprep.mubr.msk.bf16.mxu0 %vm2227_vm0, %v2226_v0  ;;  %1757 = vmatprep.mubr.msk.bf16.mxu1 %vm2227_vm0, %v2226_v0  ;;  %s566_s4 = scalar_select %p565_p10, %s2209_s16, 1  ;;  %v1964_v4 = vld [vmem:[#allocation2] sm:$0xff]   ;;  %v1965_v21 = vld [vmem:[#allocation5 + $0x8] sm:$0xff]   ;;  %v1966_v22 = vld [vmem:[#allocation5] sm:$0xff]   ;;  %vm822_vm3 = vcmask 1043456   ;;  %vm1212_vm4 = vcmask 130048  }
  0x64   : > { %1746 = vmatpush3.bf16.msra.mxu0 %v1961_v1  ;;  %1754 = vmatpush3.bf16.msra.mxu1 %v1962_v2  ;;  %s2230_s18 = smov 104   ;;  %s2233_s27 = smov 24   ;;  %vm1214_vm5 = vcmask 195584   ;;  %vm1423_vm8 = vcmask 523264  }
  0x65   : > { %s1669_s21 = sshll.u32 %s566_s4, 3  ;;  %1747 = vmatprep.subr.bf16.mxu0 %v2226_v0  ;;  %1755 = vmatprep.subr.bf16.mxu1 %v2226_v0  ;;  %s2231_s4 = smov 8  }
  0x66   : > { %s571_s22 = scalar_lea.vmem %s2627_s0, %s1669_s21  ;;  %s575_s15 = scalar_lea.vmem %s2628_s1, %s1669_s21 }
  0x67   : > { %v2470_v5 = vld [vmem:[%s571_s22] sm:$0xff]  ;;  %s2232_s21 = smov 16   ;;  %s1706_s26 = sshll.u32 %s2209_s16, 7 }
  0x68   : > { %v579_v6 = vld [vmem:[%s575_s15] sm:$0xff]  ;;  %v578_v7 = vpack.c.bf16 %v2470_v5, %v2470_v5  ;;  %1748 = vmatpush3.bf16.msra.mxu0 %v1963_v3  ;;  %1756 = vmatpush3.bf16.msra.mxu1 %v1964_v4  ;;  %s2234_s20 = smov [#allocation11]  }
  0x69   : > { %v580_v8 = vpack.c.bf16 %v579_v6, %v579_v6  ;;  %1761 = vmatprep.subr.bf16.mxu0 %v2226_v0  ;;  %1769 = vmatprep.subr.bf16.mxu1 %v2226_v0  ;;  %s2133_s22 = sshll.u32 %s2234_s20, 4  ;;  %s2134_s22 = int_to_ptr.vmem [resolvable:$false] %s2133_s22 }
  0x6a   : > { %s2135_s16 = scalar_lea.vmem %s2134_s22, 256 }
  0x6b   : > { %1750 = vmatmul.mubr.msk.bf16.vlgmr.msra.gmra.mxu0 %vm597_vm1, %v578_v7  ;;  %1758 = vmatmul.mubr.msk.bf16.vlgmr.msra.gmra.mxu1 %vm597_vm1, %v580_v8 }
  0x6c   : > { %1765 = vmatprep.mubr.msk.bf16.mxu0 %vm2227_vm0, %v2226_v0  ;;  %1771 = vmatprep.mubr.msk.bf16.mxu1 %vm2227_vm0, %v2226_v0 }
  0x6d   : > { %1762 = vmatpush3.bf16.msra.mxu0 %v1965_v21 }
  0x6e   : > { %1763 = vmatprep.subr.bf16.mxu0 %v2226_v0 }
  0x71   : > { %1764 = vmatpush3.bf16.msra.mxu0 %v1966_v22 }
  0x72   : > { %1775 = vmatprep.subr.bf16.mxu0 %v2226_v0 }
  0x74   : > { %1766 = vmatmul.mubr.msk.bf16.vlgmr.msra.gmra.mxu0 %vm597_vm1, %v580_v8 }
  0x75   : > { %1777 = vmatprep.mubr.msk.bf16.mxu0 %vm2227_vm0, %v2226_v0 }
 0x12b   : > { %v635_v9 = vpop.f32.mrf.mxu0  ;;  %v695_v11 = vpop.f32.mrf.mxu1 }
 0x12c   : > { %v641_v10 = vmul.f32 0.17677669, %v635_v9  ;;  %v758_v12 = vpack.c.bf16 %v695_v11, %v695_v11 }
 0x12d   : > { %v1751_v13 = vpop.f32.mrf.mxu0  ;;  %v1759_v14 = vpop.f32.mrf.mxu1 }
 0x12e   : > { %v757_v15 = vpack.c.bf16 %v641_v10, %v641_v10  ;;  %981 = vrot.lane.b32.xlu1 %v758_v12, %s2228_s29  ;;  %870 = vrot.lane.b32.xlu0 %v758_v12, %s2229_s17  ;;  %v765_v17 = vsel %vm760_vm2, %v758_v12, 0 }
 0x12f   : > { %v638_v16 = vpop.f32.mrf.mxu0  ;;  %v698_v18 = vpop.f32.mrf.mxu1  ;;  %1770 = vmatpush3.bf16.xpose.msra.mxu1 %v765_v17 }
 0x130   : > { %1781 = vmatprep.subr.bf16.mxu1 %v2226_v0 }
 0x131   : > { %v1752_v19 = vpop.f32.mrf.mxu0  ;;  %v1760_v20 = vpop.f32.mrf.mxu1 }
 0x132   : > { %979 = vrot.lane.b32.xlu1 %v757_v15, %s2228_s29  ;;  %867 = vrot.lane.b32.xlu0 %v757_v15, %s2229_s17 }
 0x134   : > { %v751_v37 = vpop.f32.mrf.mxu0 }
 0x135   : > { %v759_v38 = vpack.c.bf16 %v751_v37, %v751_v37 }
 0x136   : > { %1089 = vrot.lane.b32.xlu1 %v757_v15, %s2230_s18  ;;  %1091 = vrot.lane.b32.xlu0 %v758_v12, %s2230_s18  ;;  %v1767_v39 = vpop.f32.mrf.mxu0 }
 0x137   : > { %1772 = vmatmul.mubr.msk.bf16.vlgmr.msra.gmra.mxu1 %vm760_vm2, %v757_v15  ;;  %v824_v40 = vsel %vm822_vm3, %v759_v38, 0 }
 0x138   : > { %1783 = vmatprep.mubr.msk.bf16.mxu1 %vm2227_vm0, %v2226_v0  ;;  %v754_v41 = vpop.f32.mrf.mxu0  ;;  %1776 = vmatpush3.bf16.msra.mxu0 %v824_v40 }
 0x139   : > { %1787 = vmatprep.subr.bf16.mxu0 %v2226_v0 }
 0x13a   : > { %v1768_v42 = vpop.f32.mrf.mxu0 }
 0x13b   : > { %v1967_v42 = vld [vmem:[#allocation7 + $0x8] sm:$0xff]  }
 0x1a0   : > { %v871_v23 = vpop.permute.xlu0 %870  ;;  %v982_v25 = vpop.permute.xlu1 %981 }
 0x1a1   : > { %v876_v24 = vsel %vm760_vm2, %v871_v23, 0  ;;  %v987_v27 = vsel %vm760_vm2, %v982_v25, 0 }
 0x1a2   : > { %1782 = vmatpush3.bf16.xpose.msra.mxu1 %v876_v24 }
 0x1a3   : > { %1793 = vmatprep.subr.bf16.mxu1 %v2226_v0 }
 0x1a4   : > { %v868_v26 = vpop.permute.xlu0 %867  ;;  %v980_v29 = vpop.permute.xlu1 %979 }
 0x1a8   : > { %v1092_v28 = vpop.permute.xlu0 %1091  ;;  %v1090_v31 = vpop.permute.xlu1 %1089 }
 0x1a9   : > { %1784 = vmatmul.mubr.msk.bf16.vlgmr.msra.gmra.mxu1 %vm760_vm2, %v868_v26  ;;  %v1097_v30 = vsel %vm760_vm2, %v1092_v28, 0 }
 0x1aa   : > { %1794 = vmatpush3.bf16.xpose.msra.mxu1 %v987_v27  ;;  %1795 = vmatprep.mubr.msk.bf16.mxu1 %vm2227_vm0, %v2226_v0 }
 0x1ab   : > { %1805 = vmatprep.subr.bf16.mxu1 %v2226_v0 }
 0x1b1   : > { %1796 = vmatmul.mubr.msk.bf16.vlgmr.msra.gmra.mxu1 %vm760_vm2, %v980_v29 }
 0x1b2   : > { %1806 = vmatpush3.bf16.xpose.msra.mxu1 %v1097_v30  ;;  %1807 = vmatprep.mubr.msk.bf16.mxu1 %vm2227_vm0, %v2226_v0 }
 0x1b3   : > { %1817 = vmatprep.subr.bf16.mxu1 %v2226_v0 }
 0x1b9   : > { %1808 = vmatmul.mubr.msk.bf16.vlgmr.msra.gmra.mxu1 %vm760_vm2, %v1090_v31 }
 0x1ba   : > { %1821 = vmatprep.mubr.msk.bf16.mxu1 %vm2227_vm0, %v2226_v0  ;;  %1818 = vmatpush3.bf16.msra.mxu1 %v1967_v42 }
 0x1bb   : > { %1819 = vmatprep.subr.bf16.mxu1 %v2226_v0 }
 0x1f7   : > { %v801_v32 = vpop.f32.mrf.mxu1 }
 0x1f8   : > { %v807_v33 = vsel %vm760_vm2, %v801_v32, -inf }
 0x1f9   : > { %808 = vmax.xlane.f32.xlu0 %v807_v33  ;;  %v1773_v34 = vpop.f32.mrf.mxu1 }
 0x1fb   : > { %v804_v35 = vpop.f32.mrf.mxu1 }
 0x1fd   : > { %v1774_v36 = vpop.f32.mrf.mxu1 }
 0x269   : > { %v912_v43 = vpop.f32.mrf.mxu1 }
 0x26a   : > { %v918_v44 = vsel %vm760_vm2, %v912_v43, -inf }
 0x26b   : > { %919 = vmax.xlane.f32.xlu1 %v918_v44  ;;  %v1785_v45 = vpop.f32.mrf.mxu1 }
 0x26c   : > { %v1968_v45 = vld [vmem:[#allocation7] sm:$0xff]  }
 0x26d   : > { %v915_v46 = vpop.f32.mrf.mxu1  ;;  %1820 = vmatpush3.bf16.msra.mxu1 %v1968_v45 }
 0x26e   : > { %1833 = vmatprep.subr.bf16.mxu1 %v2226_v0 }
 0x26f   : > { %v1786_v47 = vpop.f32.mrf.mxu1 }
 0x271   : > { %v1023_v48 = vpop.f32.mrf.mxu1 }
 0x272   : > { %v1029_v49 = vsel %vm760_vm2, %v1023_v48, -inf }
 0x273   : > { %1030 = vmax.xlane.f32.xlu0 %v1029_v49  ;;  %v1797_v50 = vpop.f32.mrf.mxu1 }
 0x275   : > { %v1026_v51 = vpop.f32.mrf.mxu1 }
 0x277   : > { %v1798_v52 = vpop.f32.mrf.mxu1 }
 0x279   : > { %v1133_v53 = vpop.f32.mrf.mxu1 }
 0x27a   : > { %v1139_v54 = vsel %vm760_vm2, %v1133_v53, -inf }
 0x27b   : > { %1140 = vmax.xlane.f32.xlu0 %v1139_v54  ;;  %v1809_v55 = vpop.f32.mrf.mxu1 }
 0x27d   : > { %v1136_v56 = vpop.f32.mrf.mxu1 }
 0x27f   : > { %v1810_v57 = vpop.f32.mrf.mxu1 }
 0x282   : > { %v809_v58 = vpop.xlane.xlu0 %808 }
 0x283   : > { %v810_v59 = vsub.f32 %v801_v32, %v809_v58 }
 0x285   : > { %v811_v60 = vmul.f32 1.442695, %v810_v59 }
 0x287   : > { %1975 = vpow2.f32 %v811_v60 }
 0x294   : > { %v1976_v61 = vpop.eup %1975 }
 0x295   : > { %v813_v62 = vsel %vm760_vm2, %v1976_v61, 0.0 }
 0x296   : > { %814 = vadd.xlane.f32.xlu1 %v813_v62 }
 0x2a7   : > { %931 = vrot.lane.b32.xlu1 %v759_v38, %s2229_s17  ;;  %s2666_s17 = sld [smem:[#allocation24_spill]] }
 0x2f4   : > { %v920_v63 = vpop.xlane.xlu1 %919 }
 0x2f5   : > { %v921_v1 = vsub.f32 %v912_v43, %v920_v63 }
 0x2f7   : > { %v922_v2 = vmul.f32 1.442695, %v921_v1 }
 0x2f9   : > { %1977 = vpow2.f32 %v922_v2 }
 0x2fc   : > { %v1031_v3 = vpop.xlane.xlu0 %1030 }
 0x2fd   : > { %v1032_v4 = vsub.f32 %v1023_v48, %v1031_v3 }
 0x2ff   : > { %v1033_v6 = vmul.f32 1.442695, %v1032_v4 }
 0x301   : > { %1979 = vpow2.f32 %v1033_v6 }
 0x304   : > { %v1141_v7 = vpop.xlane.xlu0 %1140 }
 0x305   : > { %v1142_v8 = vsub.f32 %v1133_v53, %v1141_v7 }
 0x306   : > { %v1978_v9 = vpop.eup %1977 }
 0x307   : > { %v1143_v10 = vmul.f32 1.442695, %v1142_v8  ;;  %v924_v11 = vsel %vm760_vm2, %v1978_v9, 0.0 }
 0x308   : > { %925 = vadd.xlane.f32.xlu0 %v924_v11 }
 0x309   : > { %1981 = vpow2.f32 %v1143_v10 }
 0x30e   : > { %v1980_v12 = vpop.eup %1979 }
 0x30f   : > { %v1035_v13 = vsel %vm760_vm2, %v1980_v12, 0.0 }
 0x310   : > { %1036 = vadd.xlane.f32.xlu1 %v1035_v13  ;;  %v1970_v13 = vld [vmem:[#allocation8] sm:$0xff]  }
 0x316   : > { %v1982_v14 = vpop.eup %1981 }
 0x317   : > { %v1145_v15 = vsel %vm760_vm2, %v1982_v14, 0.0 }
 0x318   : > { %1146 = vadd.xlane.f32.xlu0 %v1145_v15 }
 0x31f   : > { %v815_v16 = vpop.xlane.xlu1 %814 }
 0x320   : > { %1983 = vrcp.f32 %v815_v16 }
 0x321   : > { %1151 = vrot.lane.b32.xlu1 %v759_v38, %s2230_s18  ;;  %s1518_s18 = scalar_lea.hbm %s2666_s17, %s1706_s26 }
 0x323   : > { %v932_v18 = vpop.permute.xlu1 %931 }
 0x324   : > { %v937_v21 = vsel %vm822_vm3, %v932_v18, 0 }
 0x32d   : > { %v1984_v17 = vpop.eup %1983 }
 0x32e   : > { %1041 = vrot.lane.b32.xlu0 %v759_v38, %s2228_s29  ;;  %v817_v19 = vmul.f32 %v1984_v17, %v1976_v61 }
 0x330   : > { %v818_v20 = vpack.c.bf16 %v817_v19, %v817_v19 }
 0x332   : > { %1778 = vmatmul.mubr.msk.bf16.vlgmr.msra.gmra.mxu0 %vm760_vm2, %v818_v20 }
 0x333   : > { %1788 = vmatpush3.bf16.msra.mxu0 %v937_v21  ;;  %1789 = vmatprep.mubr.msk.bf16.mxu0 %vm2227_vm0, %v2226_v0 }
 0x334   : > { %1799 = vmatprep.subr.bf16.mxu0 %v2226_v0 }
 0x391   : > { %v926_v22 = vpop.xlane.xlu0 %925 }
 0x392   : > { %1985 = vrcp.f32 %v926_v22 }
 0x399   : > { %v1037_v23 = vpop.xlane.xlu1 %1036 }
 0x39a   : > { %1987 = vrcp.f32 %v1037_v23  ;;  %v1691_v23 = vld [vmem:[%s2633_s6] ss:$0 sm:$0xff] }
 0x39d   : > { %v1152_v32 = vpop.permute.xlu1 %1151 }
 0x39e   : > { %v1157_v34 = vsel %vm822_vm3, %v1152_v32, 0  ;;  %v1693_v32 = vld [vmem:[#allocation10] ss:$0 sm:$0xff] }
 0x39f   : > { %v1986_v24 = vpop.eup %1985 }
 0x3a0   : > { %v928_v25 = vmul.f32 %v1986_v24, %v1978_v9 }
 0x3a1   : > { %v1147_v26 = vpop.xlane.xlu0 %1146 }
 0x3a2   : > { %1989 = vrcp.f32 %v1147_v26  ;;  %v929_v27 = vpack.c.bf16 %v928_v25, %v928_v25  ;;  %v1692_v26 = vld [vmem:[%s2634_s7] ss:$0 sm:$0xff] }
 0x3a4   : > { %1790 = vmatmul.mubr.msk.bf16.vlgmr.msra.gmra.mxu0 %vm760_vm2, %v929_v27 }
 0x3a5   : > { %v1042_v28 = vpop.permute.xlu0 %1041  ;;  %1801 = vmatprep.mubr.msk.bf16.mxu0 %vm2227_vm0, %v2226_v0 }
 0x3a6   : > { %v1047_v29 = vsel %vm822_vm3, %v1042_v28, 0 }
 0x3a7   : > { %v1988_v30 = vpop.eup %1987  ;;  %1800 = vmatpush3.bf16.msra.mxu0 %v1047_v29 }
 0x3a8   : > { %1811 = vmatprep.subr.bf16.mxu0 %v2226_v0  ;;  %v1039_v31 = vmul.f32 %v1988_v30, %v1980_v12  ;;  %v1969_v12 = vld [vmem:[#allocation8 + $0x8] sm:$0xff]   ;;  %v1973_v30 = vld [vmem:[%s2637_s10 + $0x8] sm:$0xff]  }
 0x3aa   : > { %v1040_v33 = vpack.c.bf16 %v1039_v31, %v1039_v31  ;;  %v1974_v31 = vld [vmem:[%s2637_s10] sm:$0xff]  }
 0x3ac   : > { %1802 = vmatmul.mubr.msk.bf16.vlgmr.msra.gmra.mxu0 %vm760_vm2, %v1040_v33 }
 0x3ad   : > { %1812 = vmatpush3.bf16.msra.mxu0 %v1157_v34  ;;  %1813 = vmatprep.mubr.msk.bf16.mxu0 %vm2227_vm0, %v2226_v0 }
 0x3ae   : > { %1825 = vmatprep.subr.bf16.mxu0 %v2226_v0 }
 0x3af   : > { %v1990_v35 = vpop.eup %1989 }
 0x3b0   : > { %v1149_v36 = vmul.f32 %v1990_v35, %v1982_v14  ;;  %v1972_v14 = vld [vmem:[%s2637_s10 + $0x10] sm:$0xff]  }
 0x3b2   : > { %v1150_v37 = vpack.c.bf16 %v1149_v36, %v1149_v36 }
 0x3b4   : > { %1814 = vmatmul.mubr.msk.bf16.vlgmr.msra.gmra.mxu0 %vm760_vm2, %v1150_v37 }
 0x3b5   : > { %1829 = vmatprep.mubr.msk.bf16.mxu0 %vm2227_vm0, %v2226_v0  ;;  %1826 = vmatpush3.bf16.msra.mxu0 %v1969_v12 }
 0x3b6   : > { %1827 = vmatprep.subr.bf16.mxu0 %v2226_v0 }
 0x3b9   : > { %1828 = vmatpush3.bf16.msra.mxu0 %v1970_v13 }
 0x3f2   : > { %v860_v38 = vpop.f32.mrf.mxu0 }
 0x3f4   : > { %v1779_v39 = vpop.f32.mrf.mxu0 }
 0x3f6   : > { %v863_v40 = vpop.f32.mrf.mxu0 }
 0x3f7   : > { %v1697_v40 = vld [vmem:[%s2638_s11] ss:$0 sm:$0xff] }
 0x3f8   : > { %v1780_v41 = vpop.f32.mrf.mxu0 }
 0x464   : > { %v973_v43 = vpop.f32.mrf.mxu0 }
 0x465   : > { %1200 = vrot.lane.b32.xlu1 %v973_v43, %s2231_s4  ;;  %s2667_s4 = smov %s2666_s17 }
 0x466   : > { %v1791_v44 = vpop.f32.mrf.mxu0 }
 0x468   : > { %v976_v46 = vpop.f32.mrf.mxu0 }
 0x46a   : > { %v1792_v47 = vpop.f32.mrf.mxu0 }
 0x46c   : > { %v1083_v48 = vpop.f32.mrf.mxu0 }
 0x46d   : > { %1204 = vrot.lane.b32.xlu0 %v1083_v48, %s2232_s21 }
 0x46e   : > { %v1803_v49 = vpop.f32.mrf.mxu0 }
 0x470   : > { %v1086_v50 = vpop.f32.mrf.mxu0 }
 0x472   : > { %v1804_v51 = vpop.f32.mrf.mxu0 }
 0x474   : > { %v1193_v52 = vpop.f32.mrf.mxu0 }
 0x475   : > { %1208 = vrot.lane.b32.xlu1 %v1193_v52, %s2233_s27  ;;  %s562_s27 = sand.u32 1, %s2201_s30  }
 0x476   : > { %v1815_v53 = vpop.f32.mrf.mxu0  ;;  %s1668_s28 = sshll.u32 %s562_s27, 3  ;;  %s1506_s21 = scalar_lea.sflag [#allocation4], %s562_s27 }
 0x477   : > { %s564_s15 = scalar_lea.vmem [#allocation11], %s1668_s28 }
 0x478   : > { %v1196_v54 = vpop.f32.mrf.mxu0  ;;  %s1520_s25 = sshll.u32 %s564_s15, 4  ;;  %s1521_s25 = int_to_ptr.vmem [resolvable:$true] %s1520_s25 }
 0x479   : > { %s2129_s19 = scalar_lea.vmem %s1521_s25, 128  ;;  %p2136_p1 = scmp.lt.s32.totalorder %s1521_s25, %s2134_s22 }
 0x47a   : > { %v1816_v55 = vpop.f32.mrf.mxu0  ;;  %p2130_p11 = scmp.ne.s32.totalorder %s1521_s25, %s2129_s19  ;;  %p2137_p5 = scmp.lt.s32.totalorder %s2135_s16, %s2129_s19 }
 0x47c   : > { %p2131_p13 = pnand %p2130_p11, %p2350_p4  ;;  %p2138_p3 = por %p2137_p5, %p2136_p1 }
 0x47e   : > { %p2132_p0 = pneg %p2131_p13 }
 0x480   : > { %p2139_p6 = pnand %p2138_p3, %p2132_p0 }
 0x4d7   : > { %v1201_v56 = vpop.permute.xlu1 %1200 }
 0x4d8   : > { %v1211_v58 = vsel %vm760_vm2, %v860_v38, %v1201_v56 }
 0x4df   : > { %v1205_v57 = vpop.permute.xlu0 %1204 }
 0x4e0   : > { %v1213_v59 = vsel %vm1212_vm4, %v1211_v58, %v1205_v57 }
 0x4e7   : > { %v1209_v60 = vpop.permute.xlu1 %1208 }
 0x4e8   : > { %v1215_v61 = vsel %vm1214_vm5, %v1213_v59, %v1209_v60  ;;  %v1703_v60 = vld [vmem:[%s2639_s12] ss:$0 sm:$0xff] }
 0x4e9   : > { %v1216_v62 = vpack.c.bf16 %v1215_v61, %v1215_v61 }
 0x4eb   : > { %1822 = vmatmul.mubr.msk.bf16.vlgmr.msra.gmra.mxu1 %vm597_vm1, %v1216_v62 }
 0x4ec   : > { %1841 = vmatprep.mubr.msk.bf16.mxu1 %vm2227_vm0, %v2226_v0 }
 0x5ab   : > { %v1270_v63 = vpop.f32.mrf.mxu1 }
 0x5ac   : > { %v1276_v1 = vadd.f32 %v1270_v63, %v2470_v5  ;;  %v1971_v5 = vld [vmem:[%s2637_s10 + $0x18] sm:$0xff]   ;;  %v1704_v63 = vld [vmem:[%s2640_s13] ss:$0 sm:$0xff] }
 0x5ad   : > { %v1823_v2 = vpop.f32.mrf.mxu1  ;;  %1834 = vmatpush3.bf16.msra.mxu1 %v1971_v5 }
 0x5ae   : > { %v1279_v3 = vsel %vm597_vm1, %v1276_v1, 0.0  ;;  %1835 = vmatprep.subr.bf16.mxu1 %v2226_v0 }
 0x5af   : > { %1280 = vadd.xlane.f32.xlu0 %v1279_v3  ;;  %v1273_v4 = vpop.f32.mrf.mxu1 }
 0x5b1   : > { %v1824_v6 = vpop.f32.mrf.mxu1  ;;  %1836 = vmatpush3.bf16.msra.mxu1 %v1972_v14 }
 0x5b2   : > { %1837 = vmatprep.subr.bf16.mxu1 %v2226_v0 }
 0x5b5   : > { %1838 = vmatpush3.bf16.msra.mxu1 %v1973_v30 }
 0x5b6   : > { %1839 = vmatprep.subr.bf16.mxu1 %v2226_v0 }
 0x5b9   : > { %1840 = vmatpush3.bf16.msra.mxu1 %v1974_v31 }
 0x638   : > { %v1281_v7 = vpop.xlane.xlu0 %1280 }
 0x639   : > { %v1283_v8 = vmul.f32 0.03125, %v1281_v7 }
 0x63b   : > { %v1284_v9 = vsub.f32 %v1276_v1, %v1283_v8 }
 0x63d   : > { %v1285_v10 = vmul.f32 %v1284_v9, %v1284_v9  ;;  %v1297_v24 = vmul.f32 %v1691_v23, %v1284_v9 }
 0x63f   : > { %v1286_v11 = vsel %vm597_vm1, %v1285_v10, 0.0 }
 0x640   : > { %1287 = vadd.xlane.f32.xlu1 %v1286_v11 }
 0x6c9   : > { %v1288_v15 = vpop.xlane.xlu1 %1287 }
 0x6ca   : > { %v1290_v16 = vmul.f32 0.032258064, %v1288_v15 }
 0x6cc   : > { %1991 = vrsqrt.f32 %v1290_v16  ;;  %vm1300_vm6 = vcmp.eq.f32.partialorder %v1290_v16, inf  ;;  %v1303_v19 = vand.u32 2147483648, %v1290_v16  ;;  %vm1302_vm7 = vcmp.eq.f32.partialorder %v1290_v16, 0.0 }
 0x6d9   : > { %v1992_v17 = vpop.eup %1991 }
 0x6da   : > { %v1299_v18 = vmul.f32 %v1992_v17, %v1290_v16 }
 0x6dc   : > { %v1301_v20 = vsel %vm1300_vm6, %v1290_v16, %v1299_v18 }
 0x6dd   : > { %v1304_v21 = vsel %vm1302_vm7, %v1303_v19, %v1301_v20 }
 0x6de   : > { %v1305_v22 = vadd.f32 1e-06, %v1304_v21 }
 0x6e0   : > { %1993 = vrcp.f32 %v1305_v22 }
 0x6ed   : > { %v1994_v25 = vpop.eup %1993 }
 0x6ee   : > { %v1307_v27 = vmul.f32 %v1994_v25, %v1297_v24 }
 0x6f0   : > { %v1314_v28 = vadd.f32 %v1692_v26, %v1307_v27 }
 0x6f2   : > { %v1315_v29 = vpack.c.bf16 %v1314_v28, %v1314_v28 }
 0x6f4   : > { %1830 = vmatmul.mubr.msk.bf16.vlgmr.msra.gmra.mxu0 %vm597_vm1, %v1315_v29 }
 0x7b4   : > { %v1376_v33 = vpop.f32.mrf.mxu0 }
 0x7b5   : > { %v1377_v34 = vadd.f32 %v1693_v32, %v1376_v33 }
 0x7b6   : > { %v1831_v35 = vpop.f32.mrf.mxu0 }
 0x7b7   : > { %v1382_v36 = vmax.f32 %v1377_v34, 0.0 }
 0x7b8   : > { %v1379_v37 = vpop.f32.mrf.mxu0 }
 0x7b9   : > { %v1383_v38 = vpack.c.bf16 %v1382_v36, %v1382_v36 }
 0x7ba   : > { %v1832_v39 = vpop.f32.mrf.mxu0 }
 0x7bb   : > { %1842 = vmatmul.mubr.msk.bf16.vlgmr.msra.gmra.mxu1 %vm1423_vm8, %v1383_v38 }
 0x87b   : > { %v1461_v0 = vpop.f32.mrf.mxu1 }
 0x87c   : > { %v1462_v41 = vadd.f32 %v1697_v40, %v1461_v0 }
 0x87d   : > { %v1843_v42 = vpop.f32.mrf.mxu1 }
 0x87e   : > { %v1467_v43 = vadd.f32 %v1462_v41, %v1314_v28 }
 0x87f   : > { %v1464_v44 = vpop.f32.mrf.mxu1 }
 0x880   : > { %v1470_v45 = vsel %vm597_vm1, %v1467_v43, 0.0 }
 0x881   : > { %1471 = vadd.xlane.f32.xlu0 %v1470_v45  ;;  %v1844_v46 = vpop.f32.mrf.mxu1 }
 0x90a   : > { %v1472_v47 = vpop.xlane.xlu0 %1471 }
 0x90b   : > { %v1473_v48 = vmul.f32 0.03125, %v1472_v47 }
 0x90d   : > { %v1474_v49 = vsub.f32 %v1467_v43, %v1473_v48 }
 0x90f   : > { %v1475_v50 = vmul.f32 %v1474_v49, %v1474_v49  ;;  %v1486_v61 = vmul.f32 %v1703_v60, %v1474_v49 }
 0x911   : > { %v1476_v51 = vsel %vm597_vm1, %v1475_v50, 0.0 }
 0x912   : > { %1477 = vadd.xlane.f32.xlu0 %v1476_v51 }
 0x99b   : > { %v1478_v52 = vpop.xlane.xlu0 %1477 }
 0x99c   : > { %v1479_v53 = vmul.f32 0.032258064, %v1478_v52 }
 0x99e   : > { %1995 = vrsqrt.f32 %v1479_v53  ;;  %vm1489_vm9 = vcmp.eq.f32.partialorder %v1479_v53, inf  ;;  %v1492_v56 = vand.u32 2147483648, %v1479_v53  ;;  %vm1491_vm10 = vcmp.eq.f32.partialorder %v1479_v53, 0.0 }
 0x9ab   : > { %v1996_v54 = vpop.eup %1995 }
 0x9ac   : > { %v1488_v55 = vmul.f32 %v1996_v54, %v1479_v53 }
 0x9ae   : > { %v1490_v57 = vsel %vm1489_vm9, %v1479_v53, %v1488_v55 }
 0x9af   : > { %v1493_v58 = vsel %vm1491_vm10, %v1492_v56, %v1490_v57 }
 0x9b0   : > { %v1494_v59 = vadd.f32 1e-06, %v1493_v58 }
 0x9b2   : > { %1997 = vrcp.f32 %v1494_v59 }
 0x9bf   : > { %v1998_v62 = vpop.eup %1997 }
 0x9c0   : > { %v1496_v1 = vmul.f32 %v1998_v62, %v1486_v61 }
 0x9c2   : > { %v1503_v2 = vadd.f32 %v1704_v63, %v1496_v1 }
 0x9c4   : > { %1504 = vst.msk [vmem:[%s564_s15] sm:$0xff] %vm597_vm1, %v1503_v2 }
 0x9c5   : > { %2142 = shalt.err (!%p2139_p6)
}
 0x9c6   : > { %s2143_s28 = scalar_lea.hbm %s1518_s18, 128  ;;  %s2147_s26 = scalar_lea.hbm %s2667_s4, 256 }
 0x9c7   : > { %p2144_p8 = scmp.ne.s32.totalorder %s1518_s18, %s2143_s28  ;;  %p2148_p12 = scmp.lt.s32.totalorder %s1518_s18, %s2667_s4 }
 0x9c8   : > { %p2149_p2 = scmp.lt.s32.totalorder %s2147_s26, %s2143_s28 }
 0x9c9   : > { %p2145_p7 = pnand %p2144_p8, %p2350_p4 }
 0x9ca   : > { %p2150_p10 = por %p2149_p2, %p2148_p12 }
 0x9cb   : > { %p2146_p9 = pneg %p2145_p7 }
 0x9cd   : > { %p2151_p11 = pnand %p2150_p10, %p2146_p9 }
 0x9cf   : > { %2154 = shalt.err (!%p2151_p11)
}
 0x9d0   : > { %1865 = dma.vmem_to_hbm [thread:$0]  (%p2350_p4), %s1521_s25, 128, %s1518_s18, %s1506_s21  }
 0x9d1 PF: > { %s2668_s29 = sld [smem:[#allocation19_spill]] }
 0x9d2   : > { %s2669_s17 = sld [smem:[#allocation16_spill]] }
 0x9d3   : > { %s2670_s19 = sld [smem:[#allocation21_spill]] }
 0x9d7   : > { %p1897_p13 = scmp.ge.s32.totalorder %s2668_s29, 2 }
 0x9d8   : > { %s1532_s20 = sand.u32 1, %s2669_s17  }
 0x9d9   : > { %p2671_p0 = scmp.ne.s32.totalorder %s2670_s19, 0  ;;  %s1533_s22 = scalar_lea.sflag [#allocation4], %s1532_s20 }
 0x9db   : > { %p1884_p1 = pnand %p1897_p13, %p2671_p0 }
 0x9dd   : > { %p1885_p5 = pneg %p1884_p1 }
 0x9df   : > { %2192 = dma.done.wait (%p1885_p5), %s1533_s22, 128  }
 0x9e0   : > { %2194 = vsyncadd (%p1885_p5), %s1533_s22, 4294967168  ;;  %s30_s18 = sadd.s32 1, %s2668_s29   ;;  %s2672_s16 = sld [smem:[#allocation17_spill]] }
 0x9e1   : > { %p27_p3 = scmp.ge.s32.totalorder %s30_s18, 4   ;;  %s2673_s15 = sld [smem:[#allocation22_spill]] }
 0x9e2   : > { %s2674_s23 = sld [smem:[#allocation18_spill]]  ;;  %s2676_s29 = smov %s2201_s30 }
 0x9e3   : > { %s2675_s17 = sld [smem:[#allocation20_spill]] }
 0x9e4   :  { %29 = sbr.rel (!%p27_p3) target bundleno = 10 (0xa), region = 135 }
 0x9e6   : > { %s2677_s30 = smov %s2672_s16 }
 0x9e8   : > { %s2678_s16 = smov %s2674_s23 }
 0x9e9   :  { %1538 = vsyncpa [#allocation3], 1 }
 0x9ea   :  { %1540 = vsyncpa [#allocation3 + $0x1], 1 }
 0x9eb   :  { %1541 = vsyncpa [#allocation6], 1 }
 0x9ec   :  { %1542 = vsyncpa [#allocation9], 1 }
 0x9ed   :  { %1543 = vsyncpa [#allocation4], 1 }
 0x9ee   :  { %1545 = vsyncpa [#allocation4 + $0x1], 1 }

</bundles_post_ra>
